<compile_context>
chip_gen: v6e
topology: v6e:2x2x1
jax: 0.10.0
libtpu: 0.0.40
codegen_flags: <defaults>
</compile_context>

<pallas_src>
import math

import jax
import jax.numpy as jnp
from jax import lax
from jax.experimental import pallas as pl
from jax.experimental.pallas import tpu as pltpu


_INV_SQRT2 = 1.0 / math.sqrt(2.0)


def _gelu_exact(x):
    # erf-based GELU: matches torch.nn.functional.gelu default (exact).
    # TODO(synk): if a bundle dump shows VALU-bound (tiny C), switch the gate
    # to tanh-approx GELU so the transcendental lands on the idle EUP slot.
    return 0.5 * x * (1.0 + lax.erf(x * _INV_SQRT2))


def _round_up(x, m):
    return ((x + m - 1) // m) * m


# ---------------------------------------------------------------------------
# Kernels
# ---------------------------------------------------------------------------

def ffn_kernel_resident(x_ref, w1a_ref, w1g_ref, b1a_ref, b1g_ref,
                        w2_ref, b2_ref, o_ref):
    """All weights VMEM-resident; grid over row tiles only."""
    x = x_ref[...].astype(w1a_ref.dtype)          # in-kernel cast (saves an HBM pass)
    ha = jnp.dot(x, w1a_ref[...], preferred_element_type=jnp.float32) + b1a_ref[...]
    hg = jnp.dot(x, w1g_ref[...], preferred_element_type=jnp.float32) + b1g_ref[...]
    z = ha * _gelu_exact(hg)                      # GEGLU, f32 elementwise
    # TODO(synk): dropout omitted (p=0.0 default / inference mode -> identity).
    out = jnp.dot(z.astype(w2_ref.dtype), w2_ref[...],
                  preferred_element_type=jnp.float32) + b2_ref[...]
    o_ref[...] = out.astype(o_ref.dtype)


def ffn_kernel_htiled(x_ref, w1a_ref, w1g_ref, b1a_ref, b1g_ref,
                      w2_ref, b2_ref, o_ref, acc_ref):
    """H-tiled: grid=(rows, hidden); f32 accumulator over the hidden axis."""
    h = pl.program_id(1)

    @pl.when(h == 0)
    def _init():
        acc_ref[...] = jnp.zeros_like(acc_ref)

    x = x_ref[...].astype(w1a_ref.dtype)
    ha = jnp.dot(x, w1a_ref[...], preferred_element_type=jnp.float32) + b1a_ref[...]
    hg = jnp.dot(x, w1g_ref[...], preferred_element_type=jnp.float32) + b1g_ref[...]
    z = ha * _gelu_exact(hg)
    acc_ref[...] += jnp.dot(z.astype(w2_ref.dtype), w2_ref[...],
                            preferred_element_type=jnp.float32)

    @pl.when(h == pl.num_programs(1) - 1)
    def _finalize():
        o_ref[...] = (acc_ref[...] + b2_ref[...]).astype(o_ref.dtype)


# ---------------------------------------------------------------------------
# Wrapper
# ---------------------------------------------------------------------------

def _chip_budget():
    """(vmem_limit_bytes, default_tile_m) sized per TPU generation."""
    vmem = None
    try:
        info = pltpu.get_tpu_info()
        for attr in ("vmem_capacity_bytes", "vmem_bytes", "vmem_size_bytes"):
            v = getattr(info, attr, None)
            if isinstance(v, int) and v > 0:
                vmem = v
                break
    except Exception:
        vmem = None
    if vmem is None:
        vmem = 64 * 1024 * 1024                   # conservative: assume v7x
    if vmem >= 100 * 1024 * 1024:                 # v5e / v6e (128 MiB parts)
        return 96 * 1024 * 1024, 1024
    return 48 * 1024 * 1024, 512                  # v7x (64 MiB per TC)


def prepare_ffn_params(w1, b1, w2, b2, compute_dtype=jnp.bfloat16):
    """One-time split/cast of FFN weights (keep OUT of the per-call hot path).

    w1: (C, 2H), b1: (2H,), w2: (H, C), b2: (C,)   [(in, out) layout]
    """
    C = w1.shape[0]
    H = w1.shape[1] // 2
    return dict(
        w1a=w1[:, :H].astype(compute_dtype),
        w1g=w1[:, H:].astype(compute_dtype),
        w2=w2.astype(compute_dtype),
        b1a=b1[:H].reshape(1, H).astype(jnp.float32),
        b1g=b1[H:].reshape(1, H).astype(jnp.float32),
        b2=b2.reshape(1, C).astype(jnp.float32),
    )


def ffn_forward(x, params, *, tile_m=None, tile_h=None, out_dtype=None,
                force_h_tiled=False, vmem_limit_bytes=None):
    """x: [B, N, C]; params from prepare_ffn_params. Returns [B, N, C]."""
    B, N, C = x.shape
    M = B * N
    w1a, w1g, w2 = params["w1a"], params["w1g"], params["w2"]
    b1a, b1g, b2 = params["b1a"], params["b1g"], params["b2"]
    H = w1a.shape[1]
    compute_dtype = w1a.dtype
    out_dtype = x.dtype if out_dtype is None else out_dtype

    chip_vmem_limit, chip_tile_m = _chip_budget()
    if vmem_limit_bytes is None:
        vmem_limit_bytes = chip_vmem_limit
    if tile_m is None:
        tile_m = chip_tile_m

    # Row tiling: >= 2 tiles (even grid preferred) so both v7x TCs get work.
    if M <= 8:
        TILE_M, grid_m = M, 1
    elif M <= tile_m:
        TILE_M = max(8, _round_up(pl.cdiv(M, 2), 8))
        grid_m = pl.cdiv(M, TILE_M)
    else:
        gm = pl.cdiv(M, tile_m)
        if gm % 2 == 1:
            gm += 1
        TILE_M = _round_up(pl.cdiv(M, gm), 8)
        grid_m = pl.cdiv(M, TILE_M)

    x2d = x.reshape(M, C)        # native dtype; cast happens inside the kernel

    cdt = jnp.dtype(compute_dtype).itemsize
    xdt = x.dtype.itemsize
    odt = jnp.dtype(out_dtype).itemsize
    cost = pl.CostEstimate(
        flops=6 * M * C * H,                      # two (M,C)x(C,H) + one (M,H)x(H,C)
        transcendentals=M * H,                    # erf in the GEGLU gate
        bytes_accessed=(M * C * xdt + 3 * C * H * cdt + (2 * H + C) * 4
                        + M * C * odt))

    # Resident-path VMEM footprint (weights single-buffered, x/out double-buffered,
    # f32 ha/hg/z intermediates live).
    resident_bytes = (3 * C * H * cdt + (2 * H + C) * 4
                      + 2 * TILE_M * C * xdt + 2 * TILE_M * C * odt
                      + 3 * TILE_M * H * 4)
    use_h_tiled = force_h_tiled or resident_bytes > int(0.75 * vmem_limit_bytes)

    if not use_h_tiled:
        out2d = pl.pallas_call(
            ffn_kernel_resident,
            out_shape=jax.ShapeDtypeStruct((M, C), out_dtype),
            grid_spec=pltpu.PrefetchScalarGridSpec(
                num_scalar_prefetch=0,
                grid=(grid_m,),
                in_specs=[
                    pl.BlockSpec((TILE_M, C), lambda i: (i, 0)),   # x (pipelined)
                    pl.BlockSpec((C, H), lambda i: (0, 0),
                                 pipeline_mode=pl.Buffered(1)),    # w1a (resident, x1 buf)
                    pl.BlockSpec((C, H), lambda i: (0, 0),
                                 pipeline_mode=pl.Buffered(1)),    # w1g
                    pl.BlockSpec((1, H), lambda i: (0, 0),
                                 pipeline_mode=pl.Buffered(1)),    # b1a
                    pl.BlockSpec((1, H), lambda i: (0, 0),
                                 pipeline_mode=pl.Buffered(1)),    # b1g
                    pl.BlockSpec((H, C), lambda i: (0, 0),
                                 pipeline_mode=pl.Buffered(1)),    # w2
                    pl.BlockSpec((1, C), lambda i: (0, 0),
                                 pipeline_mode=pl.Buffered(1)),    # b2
                ],
                out_specs=pl.BlockSpec((TILE_M, C), lambda i: (i, 0)),
            ),
            compiler_params=pltpu.CompilerParams(
                dimension_semantics=("parallel",),
                vmem_limit_bytes=vmem_limit_bytes),
            cost_estimate=cost,
        )(x2d, w1a, w1g, b1a, b1g, w2, b2)
        return out2d.reshape(B, N, C)

    # ---- H-tiled accumulator path (weights streamed through the pipeline) ----
    if tile_h is None:
        tile_h = min(H, 512)
    if H % 128 == 0:
        TILE_H = min(H, _round_up(tile_h, 128))
    else:
        TILE_H = H                                # no clean lane tiling -> full H
    grid_h = pl.cdiv(H, TILE_H)

    out2d = pl.pallas_call(
        ffn_kernel_htiled,
        out_shape=jax.ShapeDtypeStruct((M, C), out_dtype),
        grid_spec=pltpu.PrefetchScalarGridSpec(
            num_scalar_prefetch=0,
            grid=(grid_m, grid_h),
            in_specs=[
                pl.BlockSpec((TILE_M, C), lambda i, h: (i, 0)),       # x
                pl.BlockSpec((C, TILE_H), lambda i, h: (0, h)),       # w1a tile
                pl.BlockSpec((C, TILE_H), lambda i, h: (0, h)),       # w1g tile
                pl.BlockSpec((1, TILE_H), lambda i, h: (0, h)),       # b1a tile
                pl.BlockSpec((1, TILE_H), lambda i, h: (0, h)),       # b1g tile
                pl.BlockSpec((TILE_H, C), lambda i, h: (h, 0)),       # w2 tile
                pl.BlockSpec((1, C), lambda i, h: (0, 0),
                             pipeline_mode=pl.Buffered(1)),           # b2 (resident)
            ],
            out_specs=pl.BlockSpec((TILE_M, C), lambda i, h: (i, 0)),
            scratch_shapes=[pltpu.VMEM((TILE_M, C), jnp.float32)],
        ),
        compiler_params=pltpu.CompilerParams(
            dimension_semantics=("parallel", "arbitrary"),
            vmem_limit_bytes=vmem_limit_bytes),
        cost_estimate=cost,
    )(x2d, w1a, w1g, b1a, b1g, w2, b2)
    return out2d.reshape(B, N, C)


# ---------------------------------------------------------------------------
# Init / reference
# ---------------------------------------------------------------------------

def init_ffn_params(key, channels, mult=4, dtype=jnp.float32):
    """Deterministic init mirroring torch.nn.Linear.reset_parameters bounds."""
    hidden = channels * mult
    k1, k2, k3, k4 = jax.random.split(key, 4)
    bound1 = 1.0 / math.sqrt(channels)
    w1 = jax.random.uniform(k1, (channels, 2 * hidden), dtype,
                            minval=-bound1, maxval=bound1)
    b1 = jax.random.uniform(k2, (2 * hidden,), dtype,
                            minval=-bound1, maxval=bound1)
    bound2 = 1.0 / math.sqrt(hidden)
    w2 = jax.random.uniform(k3, (hidden, channels), dtype,
                            minval=-bound2, maxval=bound2)
    b2 = jax.random.uniform(k4, (channels,), dtype,
                            minval=-bound2, maxval=bound2)
    return w1, b1, w2, b2


def ffn_reference(x, w1, b1, w2, b2):
    """Pure-JAX f32 reference for correctness checking."""
    h = x @ w1 + b1
    hidden = w2.shape[0]
    a, g = h[..., :hidden], h[..., hidden:]
    z = a * (0.5 * g * (1.0 + lax.erf(g * _INV_SQRT2)))
    return z @ w2 + b2


if __name__ == "__main__":
    key = jax.random.PRNGKey(0)
    kx, kp, kx2, kp2 = jax.random.split(key, 4)

    # --- path 1: resident-weights kernel (TabTransformer-sized) ---
    B, N, C, MULT = 2, 8, 32, 4
    x = jax.random.normal(kx, (B, N, C), jnp.float32)
    w1, b1, w2, b2 = init_ffn_params(kp, C, MULT)
    params = prepare_ffn_params(w1, b1, w2, b2)       # one-time split/cast

    out = jax.block_until_ready(ffn_forward(x, params))
    ref = ffn_reference(x, w1, b1, w2, b2)
    assert out.shape == (B, N, C)
    err = float(jnp.max(jnp.abs(out - ref)))
    assert jnp.allclose(out, ref, atol=3e-2, rtol=3e-2), f"resident max err {err}"

    # --- path 2: H-tiled accumulator kernel (forced to exercise the path) ---
    C2, MULT2 = 64, 4
    x2 = jax.random.normal(kx2, (B, N, C2), jnp.float32)
    w1b, b1b, w2b, b2b = init_ffn_params(kp2, C2, MULT2)
    params2 = prepare_ffn_params(w1b, b1b, w2b, b2b)
    out2 = jax.block_until_ready(
        ffn_forward(x2, params2, force_h_tiled=True, tile_h=128))
    ref2 = ffn_reference(x2, w1b, b1b, w2b, b2b)
    err2 = float(jnp.max(jnp.abs(out2 - ref2)))
    assert jnp.allclose(out2, ref2, atol=3e-2, rtol=3e-2), f"h-tiled max err {err2}"

    print("KERNEL_OK")
</pallas_src>

<mosaic_0001>
module attributes {stable_mosaic.version = 11 : i64} {
  func.func @ffn_kernel_resident(%arg0: i32, %arg1: memref<8x32xf32, #tpu.memory_space<vmem>>, %arg2: memref<32x128xbf16, #tpu.memory_space<vmem>>, %arg3: memref<32x128xbf16, #tpu.memory_space<vmem>>, %arg4: memref<1x128xf32, #tpu.memory_space<vmem>>, %arg5: memref<1x128xf32, #tpu.memory_space<vmem>>, %arg6: memref<128x32xbf16, #tpu.memory_space<vmem>>, %arg7: memref<1x32xf32, #tpu.memory_space<vmem>>, %arg8: memref<8x32xf32, #tpu.memory_space<vmem>>) attributes {dimension_semantics = [#tpu.dimension_semantics<parallel>], iteration_bounds = array<i64: 2>, scalar_prefetch = 0 : i64, scratch_operands = 0 : i64, tpu.core_type = #tpu.core_type<tc>, window_params = [{transform_indices = @transform_0, window_bounds = array<i64: 8, 32>}, {pipeline_mode = #tpu.pipeline_mode<synchronous>, transform_indices = @transform_1, window_bounds = array<i64: 32, 128>}, {pipeline_mode = #tpu.pipeline_mode<synchronous>, transform_indices = @transform_2, window_bounds = array<i64: 32, 128>}, {pipeline_mode = #tpu.pipeline_mode<synchronous>, transform_indices = @transform_3, window_bounds = array<i64: 1, 128>}, {pipeline_mode = #tpu.pipeline_mode<synchronous>, transform_indices = @transform_4, window_bounds = array<i64: 1, 128>}, {pipeline_mode = #tpu.pipeline_mode<synchronous>, transform_indices = @transform_5, window_bounds = array<i64: 128, 32>}, {pipeline_mode = #tpu.pipeline_mode<synchronous>, transform_indices = @transform_6, window_bounds = array<i64: 1, 32>}, {transform_indices = @transform_7, window_bounds = array<i64: 8, 32>}]} {
    %c0 = arith.constant 0 : index
    %c0_0 = arith.constant 0 : index
    %0 = vector.load %arg1[%c0, %c0_0] : memref<8x32xf32, #tpu.memory_space<vmem>>, vector<8x32xf32>
    %1 = arith.truncf %0 : vector<8x32xf32> to vector<8x32xbf16>
    %c0_1 = arith.constant 0 : index
    %c0_2 = arith.constant 0 : index
    %2 = vector.load %arg2[%c0_1, %c0_2] : memref<32x128xbf16, #tpu.memory_space<vmem>>, vector<32x128xbf16>
    %cst = arith.constant dense<0.000000e+00> : vector<8x128xf32>
    %3 = tpu.matmul %1, %2, %cst {dimension_numbers = #tpu.dot_dimension_numbers<[1], [0], [0], [1], [0, 0, 1, 1], [], []>} : vector<8x32xbf16>, vector<32x128xbf16>, vector<8x128xf32> -> vector<8x128xf32>
    %c0_3 = arith.constant 0 : index
    %c0_4 = arith.constant 0 : index
    %4 = vector.load %arg4[%c0_3, %c0_4] : memref<1x128xf32, #tpu.memory_space<vmem>>, vector<1x128xf32>
    %5 = vector.broadcast %4 : vector<1x128xf32> to vector<8x128xf32>
    %6 = arith.addf %3, %5 : vector<8x128xf32>
    %c0_5 = arith.constant 0 : index
    %c0_6 = arith.constant 0 : index
    %7 = vector.load %arg3[%c0_5, %c0_6] : memref<32x128xbf16, #tpu.memory_space<vmem>>, vector<32x128xbf16>
    %cst_7 = arith.constant dense<0.000000e+00> : vector<8x128xf32>
    %8 = tpu.matmul %1, %7, %cst_7 {dimension_numbers = #tpu.dot_dimension_numbers<[1], [0], [0], [1], [0, 0, 1, 1], [], []>} : vector<8x32xbf16>, vector<32x128xbf16>, vector<8x128xf32> -> vector<8x128xf32>
    %c0_8 = arith.constant 0 : index
    %c0_9 = arith.constant 0 : index
    %9 = vector.load %arg5[%c0_8, %c0_9] : memref<1x128xf32, #tpu.memory_space<vmem>>, vector<1x128xf32>
    %10 = vector.broadcast %9 : vector<1x128xf32> to vector<8x128xf32>
    %11 = arith.addf %8, %10 : vector<8x128xf32>
    %cst_10 = arith.constant 5.000000e-01 : f32
    %12 = vector.broadcast %cst_10 : f32 to vector<8x128xf32>
    %13 = arith.mulf %12, %11 : vector<8x128xf32>
    %cst_11 = arith.constant 0.707106769 : f32
    %14 = vector.broadcast %cst_11 : f32 to vector<8x128xf32>
    %15 = arith.mulf %11, %14 : vector<8x128xf32>
    %16 = math.erf %15 : vector<8x128xf32>
    %cst_12 = arith.constant 1.000000e+00 : f32
    %17 = vector.broadcast %cst_12 : f32 to vector<8x128xf32>
    %18 = arith.addf %17, %16 : vector<8x128xf32>
    %19 = arith.mulf %13, %18 : vector<8x128xf32>
    %20 = arith.mulf %6, %19 : vector<8x128xf32>
    %21 = arith.truncf %20 : vector<8x128xf32> to vector<8x128xbf16>
    %c0_13 = arith.constant 0 : index
    %c0_14 = arith.constant 0 : index
    %22 = vector.load %arg6[%c0_13, %c0_14] : memref<128x32xbf16, #tpu.memory_space<vmem>>, vector<128x32xbf16>
    %cst_15 = arith.constant dense<0.000000e+00> : vector<8x32xf32>
    %23 = tpu.matmul %21, %22, %cst_15 {dimension_numbers = #tpu.dot_dimension_numbers<[1], [0], [0], [1], [0, 0, 1, 1], [], []>} : vector<8x128xbf16>, vector<128x32xbf16>, vector<8x32xf32> -> vector<8x32xf32>
    %c0_16 = arith.constant 0 : index
    %c0_17 = arith.constant 0 : index
    %24 = vector.load %arg7[%c0_16, %c0_17] : memref<1x32xf32, #tpu.memory_space<vmem>>, vector<1x32xf32>
    %25 = vector.broadcast %24 : vector<1x32xf32> to vector<8x32xf32>
    %26 = arith.addf %23, %25 : vector<8x32xf32>
    %c0_18 = arith.constant 0 : index
    %c0_19 = arith.constant 0 : index
    %27 = vector.load %arg8[%c0_18, %c0_19] : memref<8x32xf32, #tpu.memory_space<vmem>>, vector<8x32xf32>
    tpu.vector_store %arg8[%c0_18, %c0_19], %26 {strides = array<i32>} : memref<8x32xf32, #tpu.memory_space<vmem>>, vector<8x32xf32>,
    return
  }
  func.func @transform_0(%arg0: i32) -> (i32, i32) {
    %c0_i32 = arith.constant 0 : i32
    %c0_i32_0 = arith.constant 0 : i32
    return %arg0, %c0_i32 : i32, i32
  }
  func.func @transform_1(%arg0: i32) -> (i32, i32) {
    %c0_i32 = arith.constant 0 : i32
    %c0_i32_0 = arith.constant 0 : i32
    %c0_i32_1 = arith.constant 0 : i32
    return %c0_i32, %c0_i32_0 : i32, i32
  }
  func.func @transform_2(%arg0: i32) -> (i32, i32) {
    %c0_i32 = arith.constant 0 : i32
    %c0_i32_0 = arith.constant 0 : i32
    %c0_i32_1 = arith.constant 0 : i32
    return %c0_i32, %c0_i32_0 : i32, i32
  }
  func.func @transform_3(%arg0: i32) -> (i32, i32) {
    %c0_i32 = arith.constant 0 : i32
    %c0_i32_0 = arith.constant 0 : i32
    %c0_i32_1 = arith.constant 0 : i32
    return %c0_i32, %c0_i32_0 : i32, i32
  }
  func.func @transform_4(%arg0: i32) -> (i32, i32) {
    %c0_i32 = arith.constant 0 : i32
    %c0_i32_0 = arith.constant 0 : i32
    %c0_i32_1 = arith.constant 0 : i32
    return %c0_i32, %c0_i32_0 : i32, i32
  }
  func.func @transform_5(%arg0: i32) -> (i32, i32) {
    %c0_i32 = arith.constant 0 : i32
    %c0_i32_0 = arith.constant 0 : i32
    %c0_i32_1 = arith.constant 0 : i32
    return %c0_i32, %c0_i32_0 : i32, i32
  }
  func.func @transform_6(%arg0: i32) -> (i32, i32) {
    %c0_i32 = arith.constant 0 : i32
    %c0_i32_0 = arith.constant 0 : i32
    %c0_i32_1 = arith.constant 0 : i32
    return %c0_i32, %c0_i32_0 : i32, i32
  }
  func.func @transform_7(%arg0: i32) -> (i32, i32) {
    %c0_i32 = arith.constant 0 : i32
    %c0_i32_0 = arith.constant 0 : i32
    return %arg0, %c0_i32 : i32, i32
  }
}

</mosaic_0001>

<bundles_post_ra>
// kernel: tpu_custom_call.1
= control target key start
LH: loop header
LB: loop body
LE: loop exit
PB: predicated region body
PF: predicated region fallthrough
CT: control target
= control target key end

     0   :  { %12 = vsyncpa [#allocation3], 0  ;;  %s987_s0 = inlined_call_operand.vmem [shape: f32[16,32], index: 0, kind: input, shape index: {}]   ;;  %s988_s1 = inlined_call_operand.vmem [shape: bf16[32,128], index: 1, kind: input, shape index: {}]   ;;  %s989_s2 = inlined_call_operand.vmem [shape: bf16[32,128], index: 2, kind: input, shape index: {}]   ;;  %s990_s3 = inlined_call_operand.vmem [shape: f32[1,128], index: 3, kind: input, shape index: {}]   ;;  %s991_s4 = inlined_call_operand.vmem [shape: f32[1,128], index: 4, kind: input, shape index: {}]   ;;  %s992_s5 = inlined_call_operand.vmem [shape: bf16[128,32], index: 5, kind: input, shape index: {}]   ;;  %s993_s6 = inlined_call_operand.vmem [shape: f32[1,32], index: 6, kind: input, shape index: {}]   ;;  %s994_s7 = inlined_call_operand.hbm [shape: f32[16,32], index: 7, kind: output, shape index: {}]  }
   0x1   :  { %14 = vsyncpa [#allocation3 + $0x1], 0  ;;  %s837_s24 = smov 0   ;;  %s839_s25 = smov 0  }
   0x2   :  { %s841_s26 = smov 0   ;;  %s843_s27 = smov 0  }
   0x3 LB: > { %s858_s28 = sadd.s32 4294967295, %s792_s27   ;;  %s599_s29 = sadd.s32 4294967294, %s792_s27   ;;  %s792_s27 = sphi %s843_s27, %s1000_s27   ;;  %s788_s26 = sphi %s841_s26, %s999_s26   ;;  %s784_s25 = sphi %s839_s25, %s998_s25   ;;  %s780_s24 = sphi %s837_s24, %s997_s24  }
   0x4   : > { %s862_s30 = sadd.s32 1, %s792_s27   ;;  %s179_s8 = sadd.s32 1, %s788_s26 }
   0x5   : > { %s176_s9 = ssub.s32 %s792_s27, %s862_s30  ;;  %p189_p0 = scmp.ne.s32.totalorder %s788_s26, %s784_s25 }
   0x6   : > { %p177_p1 = scmp.eq.s32.totalorder %s176_s9, 0  ;;  %p190_p2 = scmp.eq.s32.totalorder %s858_s28, 1 }
   0x7   : > { %p195_p3 = scmp.ne.s32.totalorder %s784_s25, %s780_s24  ;;  %p196_p4 = scmp.eq.s32.totalorder %s599_s29, 1 }
   0x8   : > { %s873_s10 = scalar_select %p177_p1, %s788_s26, %s179_s8  }
   0x9   : > { %p875_p5 = por %p190_p2, %p189_p0  ;;  %p879_p6 = por %p196_p4, %p195_p3 }
   0xa   : > { %p602_p7 = scmp.ge.s32.totalorder %s792_s27, 1  ;;  %p239_p8 = scmp.lt.s32.totalorder %s792_s27, 3 }
   0xc   : > { %p240_p9 = pnand %p602_p7, %p239_p8 }
   0xd   : > { %p270_p10 = scmp.lt.s32.totalorder (!%p240_p9), %s858_s28, 1  ;;  %s623_s22 = sshll.u32 (!%p240_p9), %s858_s28, 7 }
   0xe   : > { %243 = sbr.rel (%p240_p9) target bundleno = 464 (0x1d0), region = 48  ;;  %s945_s13 = scalar_lea.hbm (!%p240_p9), %s994_s7, %s623_s22 }
   0xf   : > { %s796_s15 = smov (!%p240_p9), [#allocation2]  }
  0x10   : > { %s736_s16 = sshll.u32 (!%p240_p9), %s796_s15, 4  ;;  %s737_s16 = int_to_ptr.vmem [resolvable:$false] %s736_s16 }
  0x13   : > { %v718_v0 = vld [vmem:[%s988_s1 + $0x8] sm:$0xff]   ;;  %v794_v1 = vmov 0.0   ;;  %v719_v2 = vld [vmem:[%s988_s1] sm:$0xff]   ;;  %vm795_vm0 = vmmov 0   ;;  %s271_s17 = scalar_select %p270_p10, %s858_s28, 1  ;;  %vm300_vm1 = vcmask 261120  }
  0x14   : > { %641 = vmatprep.subr.bf16.mxu1 %v794_v1  ;;  %657 = vmatprep.subr.bf16.mxu0 %v794_v1  ;;  %v720_v3 = vld [vmem:[%s989_s2 + $0x8] sm:$0xff]   ;;  %v721_v6 = vld [vmem:[%s989_s2] sm:$0xff]   ;;  %v722_v7 = vld [vmem:[%s992_s5 + $0x38] sm:$0xff]  }
  0x15   : > { %642 = vmatpush3.bf16.msra.mxu1 %v718_v0  ;;  %645 = vmatprep.mubr.msk.bf16.mxu1 %vm795_vm0, %v794_v1  ;;  %s604_s18 = sshll.u32 %s271_s17, 3  ;;  %v723_v8 = vld [vmem:[%s992_s5 + $0x30] sm:$0xff]   ;;  %v724_v9 = vld [vmem:[%s992_s5 + $0x28] sm:$0xff]   ;;  %v725_v10 = vld [vmem:[%s992_s5 + $0x20] sm:$0xff]   ;;  %s738_s17 = scalar_lea.vmem %s737_s16, 256 }
  0x16   : > { %643 = vmatprep.subr.bf16.mxu1 %v794_v1  ;;  %673 = vmatprep.mubr.msk.bf16.mxu0 %vm795_vm0, %v794_v1  ;;  %s273_s23 = scalar_lea.vmem %s987_s0, %s604_s18  ;;  %v726_v11 = vld [vmem:[%s992_s5 + $0x18] sm:$0xff]   ;;  %v727_v12 = vld [vmem:[%s992_s5 + $0x10] sm:$0xff]   ;;  %v728_v13 = vld [vmem:[%s992_s5 + $0x8] sm:$0xff]   ;;  %s267_s18 = sand.u32 1, %s784_s25  }
  0x17   : > { %v275_v4 = vld [vmem:[%s273_s23] sm:$0xff]  ;;  %658 = vmatpush3.bf16.msra.mxu0 %v722_v7  ;;  %s603_s19 = sshll.u32 %s267_s18, 3  ;;  %s527_s14 = scalar_lea.sflag [#allocation3], %s267_s18 }
  0x18   : > { %v276_v5 = vpack.c.bf16 %v275_v4, %v275_v4  ;;  %659 = vmatprep.subr.bf16.mxu0 %v794_v1  ;;  %v729_v14 = vld [vmem:[%s992_s5] sm:$0xff]   ;;  %s269_s23 = scalar_lea.vmem [#allocation2], %s603_s19 }
  0x19   : > { %644 = vmatpush3.bf16.msra.mxu1 %v719_v2  ;;  %v609_v19 = vld [vmem:[%s991_s4] ss:$0 sm:$0xff]  ;;  %s540_s29 = sshll.u32 %s269_s23, 4  ;;  %s947_s29 = int_to_ptr.vmem [resolvable:$true] %s540_s29 }
  0x1a   : > { %649 = vmatprep.subr.bf16.mxu1 %v794_v1  ;;  %v605_v27 = vld [vmem:[%s990_s3] ss:$0 sm:$0xff]  ;;  %s732_s28 = scalar_lea.vmem %s947_s29, 128  ;;  %p739_p0 = scmp.lt.s32.totalorder %s947_s29, %s737_s16 }
  0x1b   : > { %660 = vmatpush3.bf16.msra.mxu0 %v723_v8  ;;  %v613_v34 = vld [vmem:[%s993_s6] ss:$0 sm:$0xff]  ;;  %p733_p11 = scmp.ne.s32.totalorder %s947_s29, %s732_s28  ;;  %p740_p1 = scmp.lt.s32.totalorder %s738_s17, %s732_s28 }
  0x1c   : > { %646 = vmatmul.mubr.msk.bf16.vlgmr.msra.gmra.mxu1 %vm300_vm1, %v276_v5  ;;  %661 = vmatprep.subr.bf16.mxu0 %v794_v1 }
  0x1d   : > { %650 = vmatpush3.bf16.msra.mxu1 %v720_v3  ;;  %653 = vmatprep.mubr.msk.bf16.mxu1 %vm795_vm0, %v794_v1  ;;  %p734_p12 = pnand %p733_p11, %p875_p5  ;;  %p741_p2 = por %p740_p1, %p739_p0 }
  0x1e   : > { %651 = vmatprep.subr.bf16.mxu1 %v794_v1 }
  0x1f   : > { %662 = vmatpush3.bf16.msra.mxu0 %v724_v9  ;;  %p735_p13 = pneg %p734_p12 }
  0x20   : > { %663 = vmatprep.subr.bf16.mxu0 %v794_v1 }
  0x21   : > { %652 = vmatpush3.bf16.msra.mxu1 %v721_v6  ;;  %p742_p3 = pnand %p741_p2, %p735_p13 }
  0x23   : > { %664 = vmatpush3.bf16.msra.mxu0 %v725_v10 }
  0x24   : > { %654 = vmatmul.mubr.msk.bf16.vlgmr.msra.gmra.mxu1 %vm300_vm1, %v276_v5  ;;  %665 = vmatprep.subr.bf16.mxu0 %v794_v1 }
  0x27   : > { %666 = vmatpush3.bf16.msra.mxu0 %v726_v11 }
  0x28   : > { %667 = vmatprep.subr.bf16.mxu0 %v794_v1 }
  0x2b   : > { %668 = vmatpush3.bf16.msra.mxu0 %v727_v12 }
  0x2c   : > { %669 = vmatprep.subr.bf16.mxu0 %v794_v1 }
  0x2f   : > { %670 = vmatpush3.bf16.msra.mxu0 %v728_v13 }
  0x30   : > { %671 = vmatprep.subr.bf16.mxu0 %v794_v1 }
  0x33   : > { %672 = vmatpush3.bf16.msra.mxu0 %v729_v14 }
  0xdc   : > { %v338_v15 = vpop.f32.mrf.mxu1 }
  0xdd   : > { %v339_v30 = vadd.f32 %v605_v27, %v338_v15 }
  0xde   : > { %v647_v16 = vpop.f32.mrf.mxu1 }
  0xe0   : > { %v341_v17 = vpop.f32.mrf.mxu1 }
  0xe2   : > { %v648_v18 = vpop.f32.mrf.mxu1 }
  0xe4   : > { %v401_v20 = vpop.f32.mrf.mxu1 }
  0xe5   : > { %v402_v21 = vadd.f32 %v609_v19, %v401_v20 }
  0xe6   : > { %v655_v22 = vpop.f32.mrf.mxu1 }
  0xe7   : > { %v408_v23 = vmul.f32 0.70710677, %v402_v21  ;;  %v407_v28 = vmul.f32 0.5, %v402_v21 }
  0xe8   : > { %v404_v24 = vpop.f32.mrf.mxu1 }
  0xe9   : > { %730 = verf.f32 %v408_v23 }
  0xea   : > { %v656_v25 = vpop.f32.mrf.mxu1 }
  0xf6   : > { %v731_v26 = vpop.eup %730 }
  0xf7   : > { %v410_v29 = vadd.f32 1.0, %v731_v26 }
  0xf9   : > { %v411_v31 = vmul.f32 %v410_v29, %v407_v28 }
  0xfb   : > { %v412_v32 = vmul.f32 %v411_v31, %v339_v30 }
  0xfd   : > { %v413_v33 = vpack.c.bf16 %v412_v32, %v412_v32 }
  0xff   : > { %674 = vmatmul.mubr.bf16.vlgmr.msra.gmra.mxu0 %v413_v33 }
 0x1bf   : > { %v519_v35 = vpop.f32.mrf.mxu0 }
 0x1c0   : > { %v520_v36 = vadd.f32 %v613_v34, %v519_v35 }
 0x1c1   : > { %v675_v37 = vpop.f32.mrf.mxu0 }
 0x1c2   : > { %525 = vst.msk [vmem:[%s269_s23] sm:$0xff] %vm300_vm1, %v520_v36 }
 0x1c3   : > { %v522_v38 = vpop.f32.mrf.mxu0 }
 0x1c4   : > { %745 = shalt.err (!%p742_p3)
}
 0x1c5   : > { %s746_s19 = scalar_lea.hbm %s945_s13, 128  ;;  %s750_s21 = scalar_lea.hbm %s994_s7, 256 }
 0x1c6   : > { %p747_p4 = scmp.ne.s32.totalorder %s945_s13, %s746_s19  ;;  %p751_p9 = scmp.lt.s32.totalorder %s945_s13, %s994_s7 }
 0x1c7   : > { %p752_p10 = scmp.lt.s32.totalorder %s750_s21, %s746_s19 }
 0x1c8   : > { %p748_p7 = pnand %p747_p4, %p875_p5 }
 0x1c9   : > { %p753_p11 = por %p752_p10, %p751_p9 }
 0x1ca   : > { %p749_p8 = pneg %p748_p7 }
 0x1cc   : > { %p754_p12 = pnand %p753_p11, %p749_p8 }
 0x1ce   : > { %757 = shalt.err (!%p754_p12)
}
 0x1cf   : > { %677 = dma.vmem_to_hbm [thread:$0]  (%p875_p5), %s947_s29, 128, %s945_s13, %s527_s14   ;;  %v676_v39 = vpop.f32.mrf.mxu0 }
 0x1d0 PF: > { %p683_p13 = scmp.ge.s32.totalorder %s792_s27, 2  ;;  %s552_s8 = sand.u32 1, %s780_s24  }
 0x1d1   : > { %s553_s9 = scalar_lea.sflag [#allocation3], %s552_s8 }
 0x1d2   : > { %p680_p0 = pnand %p683_p13, %p879_p6 }
 0x1d4   : > { %p681_p1 = pneg %p680_p0 }
 0x1d6   : > { %775 = dma.done.wait (%p681_p1), %s553_s9, 128  }
 0x1d7   : > { %777 = vsyncadd (%p681_p1), %s553_s9, 4294967168  ;;  %p17_p2 = scmp.ge.s32.totalorder %s862_s30, 4   ;;  %s997_s24 = smov %s784_s25 }
 0x1d8   : > { %s998_s25 = smov %s788_s26  ;;  %s999_s26 = smov %s873_s10 }
 0x1d9   : > { %s1000_s27 = smov %s862_s30  ;;  %19 = sbr.rel (!%p17_p2) target bundleno = 3 (0x3), region = 83 }
 0x1de   :  { %558 = vsyncpa [#allocation3], 1 }
 0x1df   :  { %560 = vsyncpa [#allocation3 + $0x1], 1 }

</bundles_post_ra>
